<compile_context>
chip_gen: v7x
topology: tpu7x:2x2x1
jax: 0.10.0
libtpu: 0.0.40
codegen_flags: <defaults>
</compile_context>

<pallas_src>
import jax
import jax.numpy as jnp
import numpy as np
from jax.experimental import pallas as pl
from jax.experimental.pallas import tpu as pltpu


def _stochastic_depth_kernel(scale_ref, x_ref, o_ref):
    """scale_ref: (row_block,1,1); x_ref/o_ref: (row_block,row_tile,128)."""
    o_ref[...] = x_ref[...] * scale_ref[...]


def _choose_tiles(n, r, itemsize, target_bytes):
    """Pick (row_block, row_tile) giving ~target_bytes blocks, (8,128)-legal."""
    lane_bytes = 128 * itemsize
    row_bytes = r * lane_bytes
    if row_bytes >= target_bytes:
        # A single batch row is already big: tile within the row.
        row_block = 1
        row_tile = max(8, (target_bytes // lane_bytes) // 8 * 8)  # sublane-aligned
        row_tile = min(row_tile, r)  # if < r it is a multiple of 8; else full dim
    else:
        # Small rows: take the whole row and block multiple batch rows per step.
        row_tile = r
        row_block = int(min(n, max(1, target_bytes // max(row_bytes, 1))))
    return row_block, row_tile


def stochastic_depth(x, *, prob: float, mode: str, seed: int, training: bool = True,
                     block_bytes: int = 2 << 20, donate_x: bool = False):
    """JAX/Pallas equivalent of StochasticDepth.forward."""
    if prob == 0.0 or not training:
        return x
    assert mode in ("row", "col")
    survival = 1.0 - prob
    key = jax.random.PRNGKey(seed)

    if mode == "col":
        # Single shared scalar draw: plain fused XLA multiply beats a kernel launch.
        keep = jax.random.bernoulli(key, p=survival, shape=())
        scale = jnp.where(keep, 1.0 / survival, 0.0).astype(x.dtype)
        return x * scale

    # ---------------- mode == 'row': Pallas broadcast-multiply ----------------
    n = x.shape[0]
    flat = x.reshape(n, -1)
    chw = flat.shape[1]
    pad = (-chw) % 128
    if pad:
        flat = jnp.pad(flat, ((0, 0), (0, pad)))
    r = flat.shape[1] // 128
    xv = flat.reshape(n, r, 128)

    # Precompute per-row scale (keep/survival) in f32, cast once to x's dtype.
    keep = jax.random.bernoulli(key, p=survival, shape=(n,))
    scale = jnp.where(keep, 1.0 / survival, 0.0).astype(x.dtype).reshape(n, 1, 1)

    row_block, row_tile = _choose_tiles(n, r, xv.dtype.itemsize, block_bytes)
    grid = (pl.cdiv(n, row_block), pl.cdiv(r, row_tile))

    itemsize = xv.dtype.itemsize
    out = pl.pallas_call(
        _stochastic_depth_kernel,
        out_shape=jax.ShapeDtypeStruct(xv.shape, xv.dtype),
        grid=grid,
        in_specs=[
            pl.BlockSpec((row_block, 1, 1), lambda i, j: (i, 0, 0)),
            pl.BlockSpec((row_block, row_tile, 128), lambda i, j: (i, j, 0)),
        ],
        out_specs=pl.BlockSpec((row_block, row_tile, 128), lambda i, j: (i, j, 0)),
        compiler_params=pltpu.CompilerParams(
            dimension_semantics=("parallel", "parallel"),
        ),
        cost_estimate=pl.CostEstimate(
            flops=int(xv.size),
            transcendentals=0,
            bytes_accessed=int(2 * xv.size * itemsize + scale.size * itemsize),
        ),
        input_output_aliases=({1: 0} if donate_x else {}),
    )(scale, xv)

    out = out.reshape(n, -1)
    if pad:
        out = out[:, :chw]
    return out.reshape(x.shape)


if __name__ == "__main__":
    key = jax.random.PRNGKey(0)
    prob = 0.25
    survival = 1.0 - prob

    # --- case 1: 'row' mode, 128-aligned NCHW activation --------------------
    x = jax.random.normal(key, (2, 4, 16, 16), dtype=jnp.float32)
    out_row = jax.block_until_ready(
        stochastic_depth(x, prob=prob, mode="row", seed=42, training=True))
    xr = np.asarray(x)
    orow = np.asarray(out_row)
    for b in range(xr.shape[0]):
        dropped = np.allclose(orow[b], 0.0)
        kept = np.allclose(orow[b], xr[b] / survival, rtol=1e-5, atol=1e-5)
        assert dropped or kept, "row-mode output must be 0 or x/survival per row"

    # --- case 2: 'row' mode, non-128-aligned CHW (padding path) -------------
    k2, k3 = jax.random.split(key)
    x2 = jax.random.normal(k2, (2, 3, 17, 17), dtype=jnp.float32)
    out2 = jax.block_until_ready(
        stochastic_depth(x2, prob=prob, mode="row", seed=3, training=True))
    x2n, o2 = np.asarray(x2), np.asarray(out2)
    assert o2.shape == x2n.shape
    for b in range(x2n.shape[0]):
        dropped = np.allclose(o2[b], 0.0)
        kept = np.allclose(o2[b], x2n[b] / survival, rtol=1e-5, atol=1e-5)
        assert dropped or kept, "padded row-mode output mismatch"

    # --- case 3: forced small blocks -> partial trailing block masking ------
    xc = jax.random.normal(k3, (4, 8, 32, 32), dtype=jnp.float32)
    out3 = jax.block_until_ready(
        stochastic_depth(xc, prob=prob, mode="row", seed=11, training=True,
                         block_bytes=12288))
    xcn, o3 = np.asarray(xc), np.asarray(out3)
    for b in range(xcn.shape[0]):
        dropped = np.allclose(o3[b], 0.0)
        kept = np.allclose(o3[b], xcn[b] / survival, rtol=1e-5, atol=1e-5)
        assert dropped or kept, "partial-block row-mode output mismatch"

    # --- case 4: 'col' mode (XLA short-circuit) ------------------------------
    out_col = jax.block_until_ready(
        stochastic_depth(x, prob=prob, mode="col", seed=7, training=True))
    ocol = np.asarray(out_col)
    dropped = np.allclose(ocol, 0.0)
    kept = np.allclose(ocol, xr / survival, rtol=1e-5, atol=1e-5)
    assert dropped or kept, "col-mode output must be 0 or x/survival globally"

    # --- case 5: identity paths ----------------------------------------------
    out_eval = stochastic_depth(x, prob=prob, mode="row", seed=42, training=False)
    assert np.allclose(np.asarray(out_eval), xr)
    out_p0 = stochastic_depth(x, prob=0.0, mode="row", seed=42, training=True)
    assert np.allclose(np.asarray(out_p0), xr)

    print("KERNEL_OK")
</pallas_src>

<mosaic_0001>
module attributes {stable_mosaic.version = 11 : i64} {
  func.func @_stochastic_depth_kernel(%arg0: i32, %arg1: i32, %arg2: memref<2x1x1xf32, #tpu.memory_space<vmem>>, %arg3: memref<2x8x128xf32, #tpu.memory_space<vmem>>, %arg4: memref<2x8x128xf32, #tpu.memory_space<vmem>>) attributes {dimension_semantics = [#tpu.dimension_semantics<parallel>, #tpu.dimension_semantics<parallel>], iteration_bounds = array<i64: 1, 1>, scalar_prefetch = 0 : i64, scratch_operands = 0 : i64, tpu.core_type = #tpu.core_type<tc>, window_params = [{transform_indices = @transform_0, window_bounds = array<i64: 2, 1, 1>}, {transform_indices = @transform_1, window_bounds = array<i64: 2, 8, 128>}, {transform_indices = @transform_2, window_bounds = array<i64: 2, 8, 128>}]} {
    %c0 = arith.constant 0 : index
    %c0_0 = arith.constant 0 : index
    %c0_1 = arith.constant 0 : index
    %0 = vector.load %arg3[%c0, %c0_0, %c0_1] : memref<2x8x128xf32, #tpu.memory_space<vmem>>, vector<2x8x128xf32>
    %c0_2 = arith.constant 0 : index
    %c0_3 = arith.constant 0 : index
    %c0_4 = arith.constant 0 : index
    %1 = vector.load %arg2[%c0_2, %c0_3, %c0_4] : memref<2x1x1xf32, #tpu.memory_space<vmem>>, vector<2x1x1xf32>
    %2 = vector.broadcast %1 : vector<2x1x1xf32> to vector<2x8x128xf32>
    %3 = arith.mulf %0, %2 : vector<2x8x128xf32>
    %c0_5 = arith.constant 0 : index
    %c0_6 = arith.constant 0 : index
    %c0_7 = arith.constant 0 : index
    %4 = vector.load %arg4[%c0_5, %c0_6, %c0_7] : memref<2x8x128xf32, #tpu.memory_space<vmem>>, vector<2x8x128xf32>
    tpu.vector_store %arg4[%c0_5, %c0_6, %c0_7], %3 {strides = array<i32>} : memref<2x8x128xf32, #tpu.memory_space<vmem>>, vector<2x8x128xf32>,
    return
  }
  func.func @transform_0(%arg0: i32, %arg1: i32) -> (i32, i32, i32) {
    %c0_i32 = arith.constant 0 : i32
    %c0_i32_0 = arith.constant 0 : i32
    %c0_i32_1 = arith.constant 0 : i32
    return %arg0, %c0_i32, %c0_i32_0 : i32, i32, i32
  }
  func.func @transform_1(%arg0: i32, %arg1: i32) -> (i32, i32, i32) {
    %c0_i32 = arith.constant 0 : i32
    %c0_i32_0 = arith.constant 0 : i32
    return %arg0, %arg1, %c0_i32 : i32, i32, i32
  }
  func.func @transform_2(%arg0: i32, %arg1: i32) -> (i32, i32, i32) {
    %c0_i32 = arith.constant 0 : i32
    %c0_i32_0 = arith.constant 0 : i32
    return %arg0, %arg1, %c0_i32 : i32, i32, i32
  }
}

</mosaic_0001>

<bundles_post_ra>
// kernel: tpu_custom_call.1
= control target key start
LH: loop header
LB: loop body
LE: loop exit
PB: predicated region body
PF: predicated region fallthrough
CT: control target
= control target key end

     0   :  { %7 = vsyncpa [#allocation3], 0  ;;  %s181_s0 = inlined_call_operand.vmem [shape: f32[2,1,1], index: 0, kind: input, shape index: {}]   ;;  %s182_s1 = inlined_call_operand.hbm [shape: f32[2,8,128], index: 1, kind: input, shape index: {}]   ;;  %s183_s2 = inlined_call_operand.hbm [shape: f32[2,8,128], index: 2, kind: output, shape index: {}]  }
   0x1   :  { %8 = vsyncpa [#allocation4], 0  ;;  %s125_s9 = smov [#allocation2]   ;;  %s77_s13 = scalar_lea.hbm %s182_s1, 256 }
   0x2   :  { %s16_s10 = sshll.u32 %s125_s9, 4  ;;  %p78_p0 = scmp.ne.s32.totalorder %s182_s1, %s77_s13  ;;  %s17_s10 = int_to_ptr.vmem [resolvable:$true] %s16_s10 }
   0x3   :  { %p81_p1 = scmp.lt.u32.totalorder %s77_s13, %s182_s1 }
   0x5   :  { %p83_p2 = pnand %p81_p1, %p78_p0 }
   0x7   :  { %86 = shalt.err (!%p83_p2)
}
   0x8   :  { %s87_s18 = scalar_lea.vmem %s17_s10, 256  ;;  %p92_p4 = scmp.lt.s32.totalorder %s17_s10, %s17_s10 }
   0x9   :  { %p88_p3 = scmp.ne.s32.totalorder %s17_s10, %s87_s18  ;;  %p93_p5 = scmp.lt.s32.totalorder %s87_s18, %s87_s18 }
   0xb   :  { %p94_p6 = por %p93_p5, %p92_p4 }
   0xd   :  { %p95_p7 = pnand %p94_p6, %p88_p3 }
   0xf   :  { %98 = shalt.err (!%p95_p7)
}
  0x10   :  { %s126_s19 = smov 128   ;;  %s127_s20 = smov 8  }
  0x11   :  { %22 = dma.hbm_to_vmem [thread:$0]  %s182_s1, 256, %s17_s10, [#allocation3], %s126_s19, %s126_s19, %s127_s20  }
  0x12   :  { %121 = dma.done.wait [#allocation3], 256  }
  0x13   :  { %122 = vsyncadd [#allocation3], 4294967040  ;;  %v128_v0 = vmov 0   ;;  %v69_v1 = vld [vmem:[%s181_s0] ss:$0 sm:$0xff]  ;;  %v27_v6 = vld [vmem:[#allocation2 + $0x8] sm:$0xff] }
  0x14   :  { %76 = vset.pattern.permute.xlu0 %v128_v0  ;;  %v70_v2 = vld [vmem:[%s181_s0 + $0x1] ss:$0 sm:$0xff]  ;;  %s129_s27 = smov [#allocation5]  }
  0x15   :  { %41 = vperm.xlu0 %76, %v69_v1   ;;  %v26_v3 = vld [vmem:[#allocation2] sm:$0xff]  ;;  %s57_s1 = sshll.u32 %s129_s27, 4  ;;  %s58_s1 = int_to_ptr.vmem [resolvable:$true] %s57_s1 }
  0x16   :  { %s99_s28 = scalar_lea.vmem %s58_s1, 256  ;;  %p104_p9 = scmp.lt.s32.totalorder %s58_s1, %s58_s1 }
  0x17   :  { %p100_p8 = scmp.ne.s32.totalorder %s58_s1, %s99_s28  ;;  %p105_p10 = scmp.lt.s32.totalorder %s99_s28, %s99_s28 }
  0x19   :  { %45 = vperm.xlu0 %76, %v70_v2   ;;  %p106_p11 = por %p105_p10, %p104_p9 }
  0x1b   :  { %p107_p12 = pnand %p106_p11, %p100_p8 }
  0x94   :  { %v42_v4 = vpop.permute.xlu0 %41 }
  0x95   :  { %v48_v5 = vmul.f32 %v42_v4, %v26_v3 }
  0x97   :  { %50 = vst [vmem:[#allocation5] sm:$0xff] %v48_v5 }
  0x98   :  { %v46_v7 = vpop.permute.xlu0 %45 }
  0x99   :  { %v49_v8 = vmul.f32 %v46_v7, %v27_v6 }
  0x9b   :  { %51 = vst [vmem:[#allocation5 + $0x8] sm:$0xff] %v49_v8 }
  0x9c   :  { %110 = shalt.err (!%p107_p12)
}
  0x9d   :  { %s111_s30 = scalar_lea.hbm %s183_s2, 256 }
  0x9e   :  { %p112_p13 = scmp.ne.s32.totalorder %s183_s2, %s111_s30  ;;  %p115_p0 = scmp.lt.u32.totalorder %s111_s30, %s183_s2 }
  0xa0   :  { %p117_p1 = pnand %p115_p0, %p112_p13 }
  0xa2   :  { %120 = shalt.err (!%p117_p1)
}
  0xa3   :  { %63 = dma.vmem_to_hbm [thread:$0]  %s58_s1, 256, %s183_s2, [#allocation4], %s126_s19, %s126_s19, %s127_s20  }
  0xa4   :  { %123 = dma.done.wait [#allocation4], 256  }
  0xa5   :  { %124 = vsyncadd [#allocation4], 4294967040 }
  0xa6   :  { %67 = vsyncpa [#allocation3], 1 }
  0xa7   :  { %68 = vsyncpa [#allocation4], 1 }

</bundles_post_ra>
